<compile_context>
chip_gen: v7x
topology: tpu7x:2x2x1
jax: 0.10.0
libtpu: 0.0.40
codegen_flags: <defaults>
</compile_context>

<pallas_src>
import functools

import jax
import jax.numpy as jnp
from jax.experimental import pallas as pl
from jax.experimental.pallas import tpu as pltpu

_EPS = 1e-5
_LANE = 128


# ----------------------------------------------------------------------------- glue ---
def _conv_out_size(n, k, pad, stride):
    return (n + 2 * pad - k) // stride + 1


def _round_up(x, m):
    return ((x + m - 1) // m) * m


def _pad_axis(a, axis, size):
    cur = a.shape[axis]
    if cur == size:
        return a
    pads = [(0, 0)] * a.ndim
    pads[axis] = (0, size - cur)
    return jnp.pad(a, pads)


def _vmem_limit_bytes():
    """Generation-aware VMEM budget: ~half of physical VMEM (64 MiB v5e/v6e, 32 MiB v7x)."""
    cap = 64 * 1024 * 1024                       # conservative default (v7x physical VMEM)
    try:
        cap = int(getattr(pltpu.get_tpu_info(), "vmem_capacity_bytes", cap))
    except Exception:                            # query unavailable -> keep conservative default
        pass
    return max(16 * 1024 * 1024, min(cap // 2, 64 * 1024 * 1024))


def _pick_k_tiling(kc):
    """Contraction-dim tiling: one full block up to 2048 (no accumulator), else 512-wide tiles."""
    if kc <= 2048:
        kc_pad = _round_up(kc, 16)               # bf16 sublane-pair friendly
        return kc_pad, kc_pad
    return _round_up(kc, 512), 512


def _pick_p_tiling(np0, bytes_per_lane, vmem_budget):
    """Pick a lane tile for the batch-folded spatial axis.

    Prefers the largest tile in {2048,...,128} that (a) fits the VMEM budget, (b) inflates the
    lane axis by at most ~25% padding, and (c) still leaves >= 2 blocks on the parallel grid axis
    (both v7x TensorCores get work).  Falls back to the largest single-block tile.
    """
    np_min = _round_up(np0, _LANE)
    single = None
    for tp in (2048, 1024, 512, 256, 128):
        if tp * bytes_per_lane > vmem_budget:
            continue
        np_pad = _round_up(np_min, tp)
        if np_pad - np_min > np_min // 4:
            continue
        if np_pad // tp >= 2:
            return np_pad, tp
        if single is None:
            single = (np_pad, tp)
    return single if single is not None else (np_min, _LANE)


def _im2col_cmajor(x_cm, k, pad, stride):
    """x_cm: (C, N, D, H, W) -> col^T (k^3*C, N*P); K ordered (kd, kh, kw, c), lanes (n, p)."""
    c, n, d, h, w = x_cm.shape
    do = _conv_out_size(d, k, pad, stride)
    ho = _conv_out_size(h, k, pad, stride)
    wo = _conv_out_size(w, k, pad, stride)
    p = do * ho * wo
    xp = jnp.pad(x_cm, ((0, 0), (0, 0), (pad, pad), (pad, pad), (pad, pad)))
    slabs = []
    for kd in range(k):
        for kh in range(k):
            for kw in range(k):
                slabs.append(
                    xp[:, :, kd:kd + stride * do:stride,
                             kh:kh + stride * ho:stride,
                             kw:kw + stride * wo:stride].reshape(c, n * p))
    col_t = jnp.stack(slabs, axis=0).reshape(k * k * k * c, n * p)
    return col_t, (do, ho, wo)


def _nearest_resize_cmajor(x_cm, size):
    """F.interpolate(x, size=int, mode='nearest') on (C, N, D, H, W) tensors."""
    _, _, d, h, w = x_cm.shape
    idx = lambda insz: (jnp.arange(size) * insz) // size
    x_cm = jnp.take(x_cm, idx(d), axis=2)
    x_cm = jnp.take(x_cm, idx(h), axis=3)
    x_cm = jnp.take(x_cm, idx(w), axis=4)
    return x_cm


def _fold_bn_t(w, b, gamma, beta, mean, var, eps=_EPS):
    """Fold conv bias + eval-mode BN into (w_t (Cout, Kc), ss (2, Cout, 1) = [scale; shift])."""
    cout = w.shape[0]
    scale = gamma / jnp.sqrt(var + eps)
    shift = beta + scale * (b - mean)
    # K ordering (kd, kh, kw, cin) -- matches _im2col_cmajor.
    w_t = jnp.transpose(w, (0, 2, 3, 4, 1)).reshape(cout, -1)
    ss = jnp.stack([scale, shift], axis=0).reshape(2, cout, 1).astype(jnp.float32)
    return w_t, ss


# -------------------------------------------------------------------- Pallas kernels ---
def _conv_bn_kernel_direct(col_ref, w_ref, ss_ref, o_ref, *, apply_relu):
    # col_ref (Kc, tp) bf16; w_ref (Cout, Kc) bf16; ss_ref (2, Cout, 1) f32; o_ref (Cout, tp)
    out = jnp.dot(w_ref[...], col_ref[...], preferred_element_type=jnp.float32)
    out = out * ss_ref[0] + ss_ref[1]
    if apply_relu:
        out = jnp.maximum(out, 0.0)
    o_ref[...] = out.astype(o_ref.dtype)


def _conv_bn_kernel_acc(col_ref, w_ref, ss_ref, o_ref, acc_ref, *, apply_relu):
    k = pl.program_id(1)

    @pl.when(k == 0)
    def _():
        acc_ref[...] = jnp.zeros_like(acc_ref)

    acc_ref[...] += jnp.dot(w_ref[...], col_ref[...], preferred_element_type=jnp.float32)

    @pl.when(k == pl.num_programs(1) - 1)
    def _():
        out = acc_ref[...] * ss_ref[0] + ss_ref[1]
        if apply_relu:
            out = jnp.maximum(out, 0.0)
        o_ref[...] = out.astype(o_ref.dtype)


def _conv_bn_add_kernel_direct(*refs, has_downsample):
    # out = relu(bn2(conv2(col)) + [bn_d(conv_d(res)) | res])   -- single-K-block variant
    if has_downsample:
        col_ref, w_ref, ss_ref, res_ref, wd_ref, ssd_ref, o_ref = refs
    else:
        col_ref, w_ref, ss_ref, res_ref, o_ref = refs
    out = jnp.dot(w_ref[...], col_ref[...], preferred_element_type=jnp.float32)
    out = out * ss_ref[0] + ss_ref[1]
    if has_downsample:
        r = jnp.dot(wd_ref[...], res_ref[...], preferred_element_type=jnp.float32)
        r = r * ssd_ref[0] + ssd_ref[1]
    else:
        r = res_ref[...].astype(jnp.float32)
    o_ref[...] = jnp.maximum(out + r, 0.0).astype(o_ref.dtype)


def _conv_bn_add_kernel_acc(*refs, has_downsample):
    # Same as above, but with a K-reduction grid axis and an f32 accumulator scratch.
    if has_downsample:
        col_ref, w_ref, ss_ref, res_ref, wd_ref, ssd_ref, o_ref, acc_ref = refs
    else:
        col_ref, w_ref, ss_ref, res_ref, o_ref, acc_ref = refs
    k = pl.program_id(1)

    @pl.when(k == 0)
    def _():
        acc_ref[...] = jnp.zeros_like(acc_ref)

    acc_ref[...] += jnp.dot(w_ref[...], col_ref[...], preferred_element_type=jnp.float32)

    @pl.when(k == pl.num_programs(1) - 1)
    def _():
        out = acc_ref[...] * ss_ref[0] + ss_ref[1]
        if has_downsample:
            r = jnp.dot(wd_ref[...], res_ref[...], preferred_element_type=jnp.float32)
            r = r * ssd_ref[0] + ssd_ref[1]
        else:
            r = res_ref[...].astype(jnp.float32)
        o_ref[...] = jnp.maximum(out + r, 0.0).astype(o_ref.dtype)


# ----------------------------------------------------------------- pallas_call wrappers
def _conv_bn_act(col_t, w_t, ss, *, apply_relu, out_dtype, vmem_budget):
    kc, np0 = col_t.shape
    cout = w_t.shape[0]
    kc_pad, tile_k = _pick_k_tiling(kc)
    out_bytes = jnp.dtype(out_dtype).itemsize
    bytes_per_lane = 2 * (tile_k * 2 + cout * out_bytes) + cout * 4   # dbl-buffered col/out + acc
    np_pad, tile_p = _pick_p_tiling(np0, bytes_per_lane, vmem_budget)

    col_t = _pad_axis(_pad_axis(col_t, 1, np_pad), 0, kc_pad).astype(jnp.bfloat16)
    w_t = _pad_axis(w_t, 1, kc_pad).astype(jnp.bfloat16)

    if kc_pad == tile_k:           # single reduction block -> no accumulator scratch
        grid = (np_pad // tile_p,)
        sem = ("parallel",)
        in_specs = [pl.BlockSpec((kc_pad, tile_p), lambda i: (0, i)),
                    pl.BlockSpec((cout, kc_pad), lambda i: (0, 0)),
                    pl.BlockSpec((2, cout, 1), lambda i: (0, 0, 0))]
        out_spec = pl.BlockSpec((cout, tile_p), lambda i: (0, i))
        scratch = []
        kern = functools.partial(_conv_bn_kernel_direct, apply_relu=apply_relu)
    else:
        grid = (np_pad // tile_p, kc_pad // tile_k)
        sem = ("parallel", "arbitrary")
        in_specs = [pl.BlockSpec((tile_k, tile_p), lambda i, k: (k, i)),
                    pl.BlockSpec((cout, tile_k), lambda i, k: (0, k)),
                    pl.BlockSpec((2, cout, 1), lambda i, k: (0, 0, 0))]
        out_spec = pl.BlockSpec((cout, tile_p), lambda i, k: (0, i))
        scratch = [pltpu.VMEM((cout, tile_p), jnp.float32)]
        kern = functools.partial(_conv_bn_kernel_acc, apply_relu=apply_relu)

    out = pl.pallas_call(
        kern,
        out_shape=jax.ShapeDtypeStruct((cout, np_pad), out_dtype),
        grid_spec=pltpu.PrefetchScalarGridSpec(
            num_scalar_prefetch=0, grid=grid, in_specs=in_specs,
            out_specs=out_spec, scratch_shapes=scratch),
        compiler_params=pltpu.CompilerParams(
            dimension_semantics=sem, vmem_limit_bytes=vmem_budget),
    )(col_t, w_t, ss)
    return out[:, :np0]


def _conv_bn_residual_add(col_t, w_t, ss, res_t, wd_t=None, ssd=None, *, vmem_budget):
    kc, np0 = col_t.shape
    cout = w_t.shape[0]
    has_ds = wd_t is not None

    if has_ds:
        cres = _round_up(res_t.shape[0], 16)     # contraction dim of the 1x1x1 downsample matmul
        res_t = _pad_axis(res_t, 0, cres)
        wd_t = _pad_axis(wd_t, 1, cres).astype(jnp.bfloat16)
    else:
        cres = res_t.shape[0]                    # == cout, added elementwise

    kc_pad, tile_k = _pick_k_tiling(kc)
    bytes_per_lane = 2 * (tile_k * 2 + cres * 2 + cout * 4) + cout * 4
    np_pad, tile_p = _pick_p_tiling(np0, bytes_per_lane, vmem_budget)

    col_t = _pad_axis(_pad_axis(col_t, 1, np_pad), 0, kc_pad).astype(jnp.bfloat16)
    w_t = _pad_axis(w_t, 1, kc_pad).astype(jnp.bfloat16)
    res_t = _pad_axis(res_t, 1, np_pad).astype(jnp.bfloat16)

    if kc_pad == tile_k:           # single reduction block -> no accumulator scratch
        grid = (np_pad // tile_p,)
        sem = ("parallel",)
        in_specs = [pl.BlockSpec((kc_pad, tile_p), lambda i: (0, i)),
                    pl.BlockSpec((cout, kc_pad), lambda i: (0, 0)),
                    pl.BlockSpec((2, cout, 1), lambda i: (0, 0, 0)),
                    pl.BlockSpec((cres, tile_p), lambda i: (0, i))]
        if has_ds:
            in_specs += [pl.BlockSpec((cout, cres), lambda i: (0, 0)),
                         pl.BlockSpec((2, cout, 1), lambda i: (0, 0, 0))]
        out_spec = pl.BlockSpec((cout, tile_p), lambda i: (0, i))
        scratch = []
        kern = functools.partial(_conv_bn_add_kernel_direct, has_downsample=has_ds)
    else:
        grid = (np_pad // tile_p, kc_pad // tile_k)
        sem = ("parallel", "arbitrary")
        in_specs = [pl.BlockSpec((tile_k, tile_p), lambda i, k: (k, i)),
                    pl.BlockSpec((cout, tile_k), lambda i, k: (0, k)),
                    pl.BlockSpec((2, cout, 1), lambda i, k: (0, 0, 0)),
                    pl.BlockSpec((cres, tile_p), lambda i, k: (0, i))]
        if has_ds:
            in_specs += [pl.BlockSpec((cout, cres), lambda i, k: (0, 0)),
                         pl.BlockSpec((2, cout, 1), lambda i, k: (0, 0, 0))]
        out_spec = pl.BlockSpec((cout, tile_p), lambda i, k: (0, i))
        scratch = [pltpu.VMEM((cout, tile_p), jnp.float32)]
        kern = functools.partial(_conv_bn_add_kernel_acc, has_downsample=has_ds)

    args = [col_t, w_t, ss, res_t] + ([wd_t, ssd] if has_ds else [])
    out = pl.pallas_call(
        kern,
        out_shape=jax.ShapeDtypeStruct((cout, np_pad), jnp.float32),
        grid_spec=pltpu.PrefetchScalarGridSpec(
            num_scalar_prefetch=0, grid=grid, in_specs=in_specs,
            out_specs=out_spec, scratch_shapes=scratch),
        compiler_params=pltpu.CompilerParams(
            dimension_semantics=sem, vmem_limit_bytes=vmem_budget),
    )(*args)
    return out[:, :np0]


# ------------------------------------------------------------------------- forward ---
def residual_block_forward(x_ncdhw, params, *, kernel_size, stride=2):
    """ResidualBlock.forward. x: (N, Cin, D, H, W) -> (N, Cout, Do, Ho, Wo)."""
    n, cin = x_ncdhw.shape[0], x_ncdhw.shape[1]
    cout = params["w1"].shape[0]
    vmem_budget = _vmem_limit_bytes()

    # Channel-major bf16 working copy; everything between the two convs stays (C, N, D, H, W).
    x_cm = jnp.transpose(x_ncdhw, (1, 0, 2, 3, 4)).astype(jnp.bfloat16)

    # ---- conv1 + bn1 + relu (dropout_rate=0.0 -> identity) ----
    w1_t, ss1 = _fold_bn_t(params["w1"], params["b1"], *params["bn1"])
    col1, (d1, h1, w1o) = _im2col_cmajor(x_cm, kernel_size, 1, stride)
    out1 = _conv_bn_act(col1, w1_t, ss1, apply_relu=True, out_dtype=jnp.bfloat16,
                        vmem_budget=vmem_budget)
    out1_cm = out1.reshape(cout, n, d1, h1, w1o)          # bf16, channel-major, no transpose

    # ---- conv2 + bn2, fused with the residual epilogue ----
    w2_t, ss2 = _fold_bn_t(params["w2"], params["b2"], *params["bn2"])
    col2, (d2, h2, w2o) = _im2col_cmajor(out1_cm, 3, 1, stride)

    # ---- residual path (torch: full-shape compare, so channel-only mismatch also resizes) ----
    residual_cm = x_cm
    if (n, cout, d2, h2, w2o) != tuple(x_ncdhw.shape):
        residual_cm = _nearest_resize_cmajor(residual_cm, w2o)
    res_flat = residual_cm.reshape(residual_cm.shape[0], n * d2 * h2 * w2o)

    if cin != cout:   # downsample_block: Conv3d(1x1x1, stride 1) + BatchNorm3d, fused in-kernel
        wd_t, ssd = _fold_bn_t(params["wd"], params["bd"], *params["bnd"])
        out = _conv_bn_residual_add(col2, w2_t, ss2, res_flat, wd_t, ssd,
                                    vmem_budget=vmem_budget)
    else:
        out = _conv_bn_residual_add(col2, w2_t, ss2, res_flat, vmem_budget=vmem_budget)

    out = out.reshape(cout, n, d2, h2, w2o)
    out = jnp.transpose(out, (1, 0, 2, 3, 4))
    return out.astype(x_ncdhw.dtype)


# ----------------------------------------------------------------------- parameters ---
def init_residual_block_params(key, in_channels, out_channels, kernel_size):
    ks = jax.random.split(key, 20)

    def bn_params(kg, kb, km, kv):
        gamma = jax.random.uniform(kg, (out_channels,), jnp.float32, 0.5, 1.5)
        beta = 0.1 * jax.random.normal(kb, (out_channels,), jnp.float32)
        mean = 0.1 * jax.random.normal(km, (out_channels,), jnp.float32)
        var = jax.random.uniform(kv, (out_channels,), jnp.float32, 0.5, 1.5)
        return (gamma, beta, mean, var)

    k1 = kernel_size
    std1 = (2.0 / (out_channels * k1 ** 3)) ** 0.5        # kaiming_normal_, fan_out, relu
    std2 = (2.0 / (out_channels * 27)) ** 0.5
    params = {
        "w1": std1 * jax.random.normal(ks[0], (out_channels, in_channels, k1, k1, k1), jnp.float32),
        "b1": 0.1 * jax.random.normal(ks[1], (out_channels,), jnp.float32),
        "bn1": bn_params(ks[2], ks[3], ks[4], ks[5]),
        "w2": std2 * jax.random.normal(ks[6], (out_channels, out_channels, 3, 3, 3), jnp.float32),
        "b2": 0.1 * jax.random.normal(ks[7], (out_channels,), jnp.float32),
        "bn2": bn_params(ks[8], ks[9], ks[10], ks[11]),
    }
    if in_channels != out_channels:
        stdd = (1.0 / in_channels) ** 0.5
        params["wd"] = stdd * jax.random.normal(ks[12], (out_channels, in_channels, 1, 1, 1), jnp.float32)
        params["bd"] = 0.1 * jax.random.normal(ks[13], (out_channels,), jnp.float32)
        params["bnd"] = bn_params(ks[14], ks[15], ks[16], ks[17])
    return params


# ------------------------------------------------------------------- pure-JAX reference
def _reference_forward(x, params, *, kernel_size, stride=2):
    # Convs use the same operand precision as the Pallas kernels (bf16 MXU operands,
    # f32 accumulation) so validation isolates structural correctness from dtype choice.
    def conv(xx, w, b, pad, s):
        y = jax.lax.conv_general_dilated(
            xx.astype(jnp.bfloat16), w.astype(jnp.bfloat16), (s, s, s), [(pad, pad)] * 3,
            dimension_numbers=("NCDHW", "OIDHW", "NCDHW"),
            preferred_element_type=jnp.float32)
        return y + b.reshape(1, -1, 1, 1, 1)

    def bn(y, stats):
        gamma, beta, mean, var = stats
        rs = lambda v: v.reshape(1, -1, 1, 1, 1)
        return (y - rs(mean)) / jnp.sqrt(rs(var) + _EPS) * rs(gamma) + rs(beta)

    out = jax.nn.relu(bn(conv(x, params["w1"], params["b1"], 1, stride), params["bn1"]))
    out = bn(conv(out.astype(jnp.bfloat16).astype(jnp.float32),   # kernel stores out1 as bf16
                  params["w2"], params["b2"], 1, stride), params["bn2"])
    residual = x
    if out.shape != residual.shape:
        size = out.shape[-1]
        idx = lambda insz: (jnp.arange(size) * insz) // size
        residual = jnp.take(residual, idx(residual.shape[2]), axis=2)
        residual = jnp.take(residual, idx(residual.shape[3]), axis=3)
        residual = jnp.take(residual, idx(residual.shape[4]), axis=4)
    if "wd" in params:
        residual = bn(conv(residual, params["wd"], params["bd"], 0, 1), params["bnd"])
    else:
        residual = residual.astype(jnp.bfloat16).astype(jnp.float32)   # kernel streams skip in bf16
    return jax.nn.relu(out + residual)


# --------------------------------------------------------------------------- driver ---
if __name__ == "__main__":
    N, CIN, COUT, S, K, STRIDE = 2, 4, 8, 16, 3, 2     # ResidualBlock(4, 8, kernel_size=3)

    key = jax.random.PRNGKey(0)
    kx, kp = jax.random.split(key)
    x = jax.random.normal(kx, (N, CIN, S, S, S), jnp.float32)   # NCDHW like PyTorch
    params = init_residual_block_params(kp, CIN, COUT, K)

    fwd = jax.jit(functools.partial(residual_block_forward, kernel_size=K, stride=STRIDE))
    out = jax.block_until_ready(fwd(x, params))

    ref = _reference_forward(x, params, kernel_size=K, stride=STRIDE)
    assert out.shape == ref.shape == (N, COUT, 4, 4, 4), (out.shape, ref.shape)
    max_err = float(jnp.max(jnp.abs(out - ref)))
    if not bool(jnp.allclose(out, ref, atol=1e-2, rtol=1e-2)):
        raise AssertionError(f"Pallas output mismatch vs reference, max abs err = {max_err}")

    print("KERNEL_OK")
</pallas_src>

<mosaic_0001>
module attributes {stable_mosaic.version = 11 : i64} {
  func.func @_conv_bn_kernel_direct(%arg0: i32, %arg1: memref<112x512xbf16, #tpu.memory_space<vmem>>, %arg2: memref<8x112xbf16, #tpu.memory_space<vmem>>, %arg3: memref<2x8x1xf32, #tpu.memory_space<vmem>>, %arg4: memref<8x512xbf16, #tpu.memory_space<vmem>>) attributes {dimension_semantics = [#tpu.dimension_semantics<parallel>], iteration_bounds = array<i64: 2>, scalar_prefetch = 0 : i64, scratch_operands = 0 : i64, tpu.core_type = #tpu.core_type<tc>, window_params = [{transform_indices = @transform_0, window_bounds = array<i64: 112, 512>}, {pipeline_mode = #tpu.pipeline_mode<synchronous>, transform_indices = @transform_1, window_bounds = array<i64: 8, 112>}, {pipeline_mode = #tpu.pipeline_mode<synchronous>, transform_indices = @transform_2, window_bounds = array<i64: 2, 8, 1>}, {transform_indices = @transform_3, window_bounds = array<i64: 8, 512>}]} {
    %c0 = arith.constant 0 : index
    %c0_0 = arith.constant 0 : index
    %0 = vector.load %arg2[%c0, %c0_0] : memref<8x112xbf16, #tpu.memory_space<vmem>>, vector<8x112xbf16>
    %c0_1 = arith.constant 0 : index
    %c0_2 = arith.constant 0 : index
    %1 = vector.load %arg1[%c0_1, %c0_2] : memref<112x512xbf16, #tpu.memory_space<vmem>>, vector<112x512xbf16>
    %cst = arith.constant dense<0.000000e+00> : vector<8x512xf32>
    %2 = tpu.matmul %0, %1, %cst {dimension_numbers = #tpu.dot_dimension_numbers<[1], [0], [0], [1], [0, 0, 1, 1], [], []>} : vector<8x112xbf16>, vector<112x512xbf16>, vector<8x512xf32> -> vector<8x512xf32>
    %c0_3 = arith.constant 0 : index
    %c0_4 = arith.constant 0 : index
    %c0_5 = arith.constant 0 : index
    %3 = vector.load %arg3[%c0_3, %c0_4, %c0_5] : memref<2x8x1xf32, #tpu.memory_space<vmem>>, vector<1x8x1xf32>
    %4 = vector.shape_cast %3 : vector<1x8x1xf32> to vector<8x1xf32>
    %5 = vector.broadcast %4 : vector<8x1xf32> to vector<8x512xf32>
    %6 = arith.mulf %2, %5 : vector<8x512xf32>
    %c1 = arith.constant 1 : index
    %c0_6 = arith.constant 0 : index
    %c0_7 = arith.constant 0 : index
    %7 = vector.load %arg3[%c1, %c0_6, %c0_7] : memref<2x8x1xf32, #tpu.memory_space<vmem>>, vector<1x8x1xf32>
    %8 = vector.shape_cast %7 : vector<1x8x1xf32> to vector<8x1xf32>
    %9 = vector.broadcast %8 : vector<8x1xf32> to vector<8x512xf32>
    %10 = arith.addf %6, %9 : vector<8x512xf32>
    %cst_8 = arith.constant 0.000000e+00 : f32
    %11 = vector.broadcast %cst_8 : f32 to vector<8x512xf32>
    %12 = arith.maximumf %10, %11 : vector<8x512xf32>
    %13 = arith.truncf %12 : vector<8x512xf32> to vector<8x512xbf16>
    %c0_9 = arith.constant 0 : index
    %c0_10 = arith.constant 0 : index
    %14 = vector.load %arg4[%c0_9, %c0_10] : memref<8x512xbf16, #tpu.memory_space<vmem>>, vector<8x512xbf16>
    tpu.vector_store %arg4[%c0_9, %c0_10], %13 {strides = array<i32>} : memref<8x512xbf16, #tpu.memory_space<vmem>>, vector<8x512xbf16>,
    return
  }
  func.func @transform_0(%arg0: i32) -> (i32, i32) {
    %c0_i32 = arith.constant 0 : i32
    %c0_i32_0 = arith.constant 0 : i32
    return %c0_i32, %arg0 : i32, i32
  }
  func.func @transform_1(%arg0: i32) -> (i32, i32) {
    %c0_i32 = arith.constant 0 : i32
    %c0_i32_0 = arith.constant 0 : i32
    %c0_i32_1 = arith.constant 0 : i32
    return %c0_i32, %c0_i32_0 : i32, i32
  }
  func.func @transform_2(%arg0: i32) -> (i32, i32, i32) {
    %c0_i32 = arith.constant 0 : i32
    %c0_i32_0 = arith.constant 0 : i32
    %c0_i32_1 = arith.constant 0 : i32
    %c0_i32_2 = arith.constant 0 : i32
    return %c0_i32, %c0_i32_0, %c0_i32_1 : i32, i32, i32
  }
  func.func @transform_3(%arg0: i32) -> (i32, i32) {
    %c0_i32 = arith.constant 0 : i32
    %c0_i32_0 = arith.constant 0 : i32
    return %c0_i32, %arg0 : i32, i32
  }
}

module attributes {stable_mosaic.version = 11 : i64} {
  func.func @_conv_bn_add_kernel_direct(%arg0: i32, %arg1: memref<224x128xbf16, #tpu.memory_space<vmem>>, %arg2: memref<8x224xbf16, #tpu.memory_space<vmem>>, %arg3: memref<2x8x1xf32, #tpu.memory_space<vmem>>, %arg4: memref<16x128xbf16, #tpu.memory_space<vmem>>, %arg5: memref<8x16xbf16, #tpu.memory_space<vmem>>, %arg6: memref<2x8x1xf32, #tpu.memory_space<vmem>>, %arg7: memref<8x128xf32, #tpu.memory_space<vmem>>) attributes {dimension_semantics = [#tpu.dimension_semantics<parallel>], iteration_bounds = array<i64: 1>, scalar_prefetch = 0 : i64, scratch_operands = 0 : i64, tpu.core_type = #tpu.core_type<tc>, window_params = [{transform_indices = @transform_0, window_bounds = array<i64: 224, 128>}, {pipeline_mode = #tpu.pipeline_mode<synchronous>, transform_indices = @transform_1, window_bounds = array<i64: 8, 224>}, {pipeline_mode = #tpu.pipeline_mode<synchronous>, transform_indices = @transform_2, window_bounds = array<i64: 2, 8, 1>}, {transform_indices = @transform_3, window_bounds = array<i64: 16, 128>}, {pipeline_mode = #tpu.pipeline_mode<synchronous>, transform_indices = @transform_4, window_bounds = array<i64: 8, 16>}, {pipeline_mode = #tpu.pipeline_mode<synchronous>, transform_indices = @transform_5, window_bounds = array<i64: 2, 8, 1>}, {transform_indices = @transform_6, window_bounds = array<i64: 8, 128>}]} {
    %c0 = arith.constant 0 : index
    %c0_0 = arith.constant 0 : index
    %0 = vector.load %arg2[%c0, %c0_0] : memref<8x224xbf16, #tpu.memory_space<vmem>>, vector<8x224xbf16>
    %c0_1 = arith.constant 0 : index
    %c0_2 = arith.constant 0 : index
    %1 = vector.load %arg1[%c0_1, %c0_2] : memref<224x128xbf16, #tpu.memory_space<vmem>>, vector<224x128xbf16>
    %cst = arith.constant dense<0.000000e+00> : vector<8x128xf32>
    %2 = tpu.matmul %0, %1, %cst {dimension_numbers = #tpu.dot_dimension_numbers<[1], [0], [0], [1], [0, 0, 1, 1], [], []>} : vector<8x224xbf16>, vector<224x128xbf16>, vector<8x128xf32> -> vector<8x128xf32>
    %c0_3 = arith.constant 0 : index
    %c0_4 = arith.constant 0 : index
    %c0_5 = arith.constant 0 : index
    %3 = vector.load %arg3[%c0_3, %c0_4, %c0_5] : memref<2x8x1xf32, #tpu.memory_space<vmem>>, vector<1x8x1xf32>
    %4 = vector.shape_cast %3 : vector<1x8x1xf32> to vector<8x1xf32>
    %5 = vector.broadcast %4 : vector<8x1xf32> to vector<8x128xf32>
    %6 = arith.mulf %2, %5 : vector<8x128xf32>
    %c1 = arith.constant 1 : index
    %c0_6 = arith.constant 0 : index
    %c0_7 = arith.constant 0 : index
    %7 = vector.load %arg3[%c1, %c0_6, %c0_7] : memref<2x8x1xf32, #tpu.memory_space<vmem>>, vector<1x8x1xf32>
    %8 = vector.shape_cast %7 : vector<1x8x1xf32> to vector<8x1xf32>
    %9 = vector.broadcast %8 : vector<8x1xf32> to vector<8x128xf32>
    %10 = arith.addf %6, %9 : vector<8x128xf32>
    %c0_8 = arith.constant 0 : index
    %c0_9 = arith.constant 0 : index
    %11 = vector.load %arg5[%c0_8, %c0_9] : memref<8x16xbf16, #tpu.memory_space<vmem>>, vector<8x16xbf16>
    %c0_10 = arith.constant 0 : index
    %c0_11 = arith.constant 0 : index
    %12 = vector.load %arg4[%c0_10, %c0_11] : memref<16x128xbf16, #tpu.memory_space<vmem>>, vector<16x128xbf16>
    %cst_12 = arith.constant dense<0.000000e+00> : vector<8x128xf32>
    %13 = tpu.matmul %11, %12, %cst_12 {dimension_numbers = #tpu.dot_dimension_numbers<[1], [0], [0], [1], [0, 0, 1, 1], [], []>} : vector<8x16xbf16>, vector<16x128xbf16>, vector<8x128xf32> -> vector<8x128xf32>
    %c0_13 = arith.constant 0 : index
    %c0_14 = arith.constant 0 : index
    %c0_15 = arith.constant 0 : index
    %14 = vector.load %arg6[%c0_13, %c0_14, %c0_15] : memref<2x8x1xf32, #tpu.memory_space<vmem>>, vector<1x8x1xf32>
    %15 = vector.shape_cast %14 : vector<1x8x1xf32> to vector<8x1xf32>
    %16 = vector.broadcast %15 : vector<8x1xf32> to vector<8x128xf32>
    %17 = arith.mulf %13, %16 : vector<8x128xf32>
    %c1_16 = arith.constant 1 : index
    %c0_17 = arith.constant 0 : index
    %c0_18 = arith.constant 0 : index
    %18 = vector.load %arg6[%c1_16, %c0_17, %c0_18] : memref<2x8x1xf32, #tpu.memory_space<vmem>>, vector<1x8x1xf32>
    %19 = vector.shape_cast %18 : vector<1x8x1xf32> to vector<8x1xf32>
    %20 = vector.broadcast %19 : vector<8x1xf32> to vector<8x128xf32>
    %21 = arith.addf %17, %20 : vector<8x128xf32>
    %22 = arith.addf %10, %21 : vector<8x128xf32>
    %cst_19 = arith.constant 0.000000e+00 : f32
    %23 = vector.broadcast %cst_19 : f32 to vector<8x128xf32>
    %24 = arith.maximumf %22, %23 : vector<8x128xf32>
    %c0_20 = arith.constant 0 : index
    %c0_21 = arith.constant 0 : index
    %25 = vector.load %arg7[%c0_20, %c0_21] : memref<8x128xf32, #tpu.memory_space<vmem>>, vector<8x128xf32>
    tpu.vector_store %arg7[%c0_20, %c0_21], %24 {strides = array<i32>} : memref<8x128xf32, #tpu.memory_space<vmem>>, vector<8x128xf32>,
    return
  }
  func.func @transform_0(%arg0: i32) -> (i32, i32) {
    %c0_i32 = arith.constant 0 : i32
    %c0_i32_0 = arith.constant 0 : i32
    return %c0_i32, %arg0 : i32, i32
  }
  func.func @transform_1(%arg0: i32) -> (i32, i32) {
    %c0_i32 = arith.constant 0 : i32
    %c0_i32_0 = arith.constant 0 : i32
    %c0_i32_1 = arith.constant 0 : i32
    return %c0_i32, %c0_i32_0 : i32, i32
  }
  func.func @transform_2(%arg0: i32) -> (i32, i32, i32) {
    %c0_i32 = arith.constant 0 : i32
    %c0_i32_0 = arith.constant 0 : i32
    %c0_i32_1 = arith.constant 0 : i32
    %c0_i32_2 = arith.constant 0 : i32
    return %c0_i32, %c0_i32_0, %c0_i32_1 : i32, i32, i32
  }
  func.func @transform_3(%arg0: i32) -> (i32, i32) {
    %c0_i32 = arith.constant 0 : i32
    %c0_i32_0 = arith.constant 0 : i32
    return %c0_i32, %arg0 : i32, i32
  }
  func.func @transform_4(%arg0: i32) -> (i32, i32) {
    %c0_i32 = arith.constant 0 : i32
    %c0_i32_0 = arith.constant 0 : i32
    %c0_i32_1 = arith.constant 0 : i32
    return %c0_i32, %c0_i32_0 : i32, i32
  }
  func.func @transform_5(%arg0: i32) -> (i32, i32, i32) {
    %c0_i32 = arith.constant 0 : i32
    %c0_i32_0 = arith.constant 0 : i32
    %c0_i32_1 = arith.constant 0 : i32
    %c0_i32_2 = arith.constant 0 : i32
    return %c0_i32, %c0_i32_0, %c0_i32_1 : i32, i32, i32
  }
  func.func @transform_6(%arg0: i32) -> (i32, i32) {
    %c0_i32 = arith.constant 0 : i32
    %c0_i32_0 = arith.constant 0 : i32
    return %c0_i32, %arg0 : i32, i32
  }
}

</mosaic_0001>

<bundles_post_ra>
// kernel: residual_block_forward.2
= control target key start
LH: loop header
LB: loop body
LE: loop exit
PB: predicated region body
PF: predicated region fallthrough
CT: control target
= control target key end

     0   :  { %s770_s12 = smov 0   ;;  %s772_s13 = smov 0   ;;  %s921_s0 = inlined_call_operand.vmem [shape: bf16[112,1024], index: 0, kind: input, shape index: {}]   ;;  %s922_s1 = inlined_call_operand.vmem [shape: bf16[8,112], index: 1, kind: input, shape index: {}]   ;;  %s923_s2 = inlined_call_operand.vmem [shape: f32[2,8,1], index: 2, kind: input, shape index: {}]   ;;  %s924_s3 = inlined_call_operand.vmem [shape: bf16[8,1024], index: 3, kind: output, shape index: {}]  }
   0x1   :  { %s774_s14 = smov 0  }
   0x2 LB: > { %s608_s15 = sadd.s32 4294967295, %s747_s14   ;;  %s787_s16 = sadd.s32 1, %s747_s14   ;;  %s747_s14 = sphi %s774_s14, %s927_s14   ;;  %s743_s13 = sphi %s772_s13, %s926_s13   ;;  %s739_s12 = sphi %s770_s12, %s925_s12  }
   0x3   : > { %s17_s17 = ssub.s32 %s747_s14, %s787_s16  ;;  %s20_s18 = sadd.s32 1, %s743_s13 }
   0x4   : > { %p18_p0 = scmp.eq.s32.totalorder %s17_s17, 0  ;;  %p27_p1 = scmp.ne.s32.totalorder %s743_s13, %s739_s12 }
   0x5   : > { %p28_p2 = scmp.eq.s32.totalorder %s747_s14, 0  ;;  %p611_p4 = scmp.ge.s32.totalorder %s747_s14, 2 }
   0x6   : > { %s796_s19 = scalar_select %p18_p0, %s743_s13, %s20_s18  }
   0x7   : > { %p29_p3 = por %p28_p2, %p27_p1  ;;  %127 = sbr.rel (%p611_p4) target bundleno = 32 (0x20), region = 24 }
   0xe   : > { %130 = sbr.rel (!%p29_p3) target bundleno = 32 (0x20), region = 28  ;;  %s132_s20 = sand.u32 (%p29_p3), 1, %s743_s13  }
   0xf   : > { %s652_s21 = sshll.u32 (%p29_p3), %s747_s14, 4  ;;  %s655_s22 = smul.u32 (%p29_p3), 224, %s132_s20 }
  0x10   : > { %s804_s25 = scalar_lea.vmem (%p29_p3), %s921_s0, %s652_s21 }
  0x11   : > { %v150_v0 = vld [vmem:[%s804_s25] sm:$0xff] (%p29_p3)  ;;  %v152_v1 = vld [vmem:[%s804_s25 + $0x8] sm:$0xff] (%p29_p3)  ;;  %s812_s26 = scalar_lea.vmem (%p29_p3), [#allocation2], %s655_s22 }
  0x12   : > { %v154_v2 = vld [vmem:[%s804_s25 + $0x20] sm:$0xff] (%p29_p3)  ;;  %v156_v3 = vld [vmem:[%s804_s25 + $0x28] sm:$0xff] (%p29_p3)  ;;  %151 = vst [vmem:[%s812_s26] sm:$0xff] (%p29_p3), %v150_v0  ;;  %153 = vst [vmem:[%s812_s26 + $0x8] sm:$0xff] (%p29_p3), %v152_v1 }
  0x13   : > { %v158_v4 = vld [vmem:[%s804_s25 + $0x40] sm:$0xff] (%p29_p3)  ;;  %v160_v5 = vld [vmem:[%s804_s25 + $0x48] sm:$0xff] (%p29_p3)  ;;  %155 = vst [vmem:[%s812_s26 + $0x10] sm:$0xff] (%p29_p3), %v154_v2  ;;  %157 = vst [vmem:[%s812_s26 + $0x18] sm:$0xff] (%p29_p3), %v156_v3 }
  0x14   : > { %159 = vst [vmem:[%s812_s26 + $0x20] sm:$0xff] (%p29_p3), %v158_v4  ;;  %161 = vst [vmem:[%s812_s26 + $0x28] sm:$0xff] (%p29_p3), %v160_v5  ;;  %v162_v6 = vld [vmem:[%s804_s25 + $0x60] sm:$0xff] (%p29_p3)  ;;  %v164_v7 = vld [vmem:[%s804_s25 + $0x68] sm:$0xff] (%p29_p3) }
  0x15   : > { %v166_v8 = vld [vmem:[%s804_s25 + $0x80] sm:$0xff]  ;;  %163 = vst [vmem:[%s812_s26 + $0x30] sm:$0xff] %v162_v6  ;;  %165 = vst [vmem:[%s812_s26 + $0x38] sm:$0xff] %v164_v7  ;;  %v168_v9 = vld [vmem:[%s804_s25 + $0x88] sm:$0xff] }
  0x16   : > { %167 = vst [vmem:[%s812_s26 + $0x40] sm:$0xff] %v166_v8  ;;  %v170_v10 = vld [vmem:[%s804_s25 + $0xa0] sm:$0xff]  ;;  %v172_v11 = vld [vmem:[%s804_s25 + $0xa8] sm:$0xff]  ;;  %169 = vst [vmem:[%s812_s26 + $0x48] sm:$0xff] %v168_v9 }
  0x17   : > { %171 = vst [vmem:[%s812_s26 + $0x50] sm:$0xff] %v170_v10  ;;  %173 = vst [vmem:[%s812_s26 + $0x58] sm:$0xff] %v172_v11  ;;  %v174_v12 = vld [vmem:[%s804_s25 + $0xc0] sm:$0xff]  ;;  %v176_v13 = vld [vmem:[%s804_s25 + $0xc8] sm:$0xff] }
  0x18   : > { %v178_v14 = vld [vmem:[%s804_s25 + $0xe0] sm:$0xff]  ;;  %175 = vst [vmem:[%s812_s26 + $0x60] sm:$0xff] %v174_v12  ;;  %177 = vst [vmem:[%s812_s26 + $0x68] sm:$0xff] %v176_v13  ;;  %v180_v15 = vld [vmem:[%s804_s25 + $0xe8] sm:$0xff] }
  0x19   : > { %179 = vst [vmem:[%s812_s26 + $0x70] sm:$0xff] %v178_v14  ;;  %v182_v16 = vld [vmem:[%s804_s25 + $0x100] sm:$0xff]  ;;  %v184_v17 = vld [vmem:[%s804_s25 + $0x108] sm:$0xff]  ;;  %181 = vst [vmem:[%s812_s26 + $0x78] sm:$0xff] %v180_v15 }
  0x1a   : > { %183 = vst [vmem:[%s812_s26 + $0x80] sm:$0xff] %v182_v16  ;;  %185 = vst [vmem:[%s812_s26 + $0x88] sm:$0xff] %v184_v17  ;;  %v186_v18 = vld [vmem:[%s804_s25 + $0x120] sm:$0xff]  ;;  %v188_v19 = vld [vmem:[%s804_s25 + $0x128] sm:$0xff] }
  0x1b   : > { %v190_v20 = vld [vmem:[%s804_s25 + $0x140] sm:$0xff]  ;;  %187 = vst [vmem:[%s812_s26 + $0x90] sm:$0xff] %v186_v18  ;;  %189 = vst [vmem:[%s812_s26 + $0x98] sm:$0xff] %v188_v19  ;;  %v192_v21 = vld [vmem:[%s804_s25 + $0x148] sm:$0xff] }
  0x1c   : > { %191 = vst [vmem:[%s812_s26 + $0xa0] sm:$0xff] %v190_v20  ;;  %v194_v22 = vld [vmem:[%s804_s25 + $0x160] sm:$0xff]  ;;  %v196_v23 = vld [vmem:[%s804_s25 + $0x168] sm:$0xff]  ;;  %193 = vst [vmem:[%s812_s26 + $0xa8] sm:$0xff] %v192_v21 }
  0x1d   : > { %195 = vst [vmem:[%s812_s26 + $0xb0] sm:$0xff] %v194_v22  ;;  %197 = vst [vmem:[%s812_s26 + $0xb8] sm:$0xff] %v196_v23  ;;  %v198_v24 = vld [vmem:[%s804_s25 + $0x180] sm:$0xff]  ;;  %v200_v25 = vld [vmem:[%s804_s25 + $0x188] sm:$0xff] }
  0x1e   : > { %v202_v26 = vld [vmem:[%s804_s25 + $0x1a0] sm:$0xff]  ;;  %199 = vst [vmem:[%s812_s26 + $0xc0] sm:$0xff] %v198_v24  ;;  %201 = vst [vmem:[%s812_s26 + $0xc8] sm:$0xff] %v200_v25  ;;  %v204_v27 = vld [vmem:[%s804_s25 + $0x1a8] sm:$0xff] }
  0x1f   : > { %203 = vst [vmem:[%s812_s26 + $0xd0] sm:$0xff] %v202_v26  ;;  %205 = vst [vmem:[%s812_s26 + $0xd8] sm:$0xff] %v204_v27 }
  0x20 PF: > { %p614_p5 = scmp.ge.s32.totalorder %s747_s14, 1  ;;  %p210_p6 = scmp.lt.s32.totalorder %s747_s14, 3 }
  0x22   : > { %p211_p7 = pnand %p614_p5, %p210_p6 }
  0x23   : > { %s217_s27 = sand.u32 (!%p211_p7), 1, %s739_s12   ;;  %v503_v28 = vld [vmem:[%s923_s2] sm:$0xff] (!%p211_p7)  ;;  %v749_v29 = vmov (!%p211_p7), 0   ;;  %v647_v30 = vld [vmem:[%s923_s2 + $0x8] sm:$0xff] (!%p211_p7)  ;;  %vm417_vm0 = vcmask (!%p211_p7), 916480   ;;  %s615_s9 = sshll.u32 (!%p211_p7), %s608_s15, 2 }
  0x24   : > { %214 = sbr.rel (%p211_p7) target bundleno = 292 (0x124), region = 51  ;;  %453 = vmatprep.mubr.bf16.mxu0 (!%p211_p7), %v749_v29  ;;  %494 = vmatprep.mubr.bf16.mxu1 (!%p211_p7), %v749_v29  ;;  %v248_v59 = vld [vmem:[%s922_s1] sm:$0xf] (!%p211_p7)  ;;  %p242_p8 = scmp.lt.s32.totalorder (!%p211_p7), %s615_s9, 7 }
  0x25   : > { %s656_s30 = smul.u32 (!%p211_p7), 224, %s217_s27  ;;  %682 = vset.pattern.permute.xlu0 (!%p211_p7), %v749_v29 }
  0x26   : > { %506 = vperm.xlu0 (!%p211_p7), %682, %v503_v28  }
  0x27   : > { %s873_s6 = scalar_lea.vmem (!%p211_p7), [#allocation2], %s656_s30 }
  0x28   : > { %v683_v31 = vld [vmem:[%s873_s6 + $0x4] ss:$16 sps:$4 sm:$0xff] (!%p211_p7)   ;;  %v685_v32 = vld [vmem:[%s873_s6 + $0xc] ss:$16 sps:$4 sm:$0xff] (!%p211_p7)   ;;  %v687_v33 = vld [vmem:[%s873_s6] ss:$16 sps:$4 sm:$0xff] (!%p211_p7)  }
  0x29   : > { %421 = vmatprep.subr.bf16.mxu0 (!%p211_p7), %v683_v31  ;;  %v688_v34 = vld [vmem:[%s873_s6 + $0x8] ss:$16 sps:$4 sm:$0xff] (!%p211_p7)   ;;  %462 = vmatprep.subr.bf16.mxu1 (!%p211_p7), %v685_v32  ;;  %v689_v35 = vld [vmem:[%s873_s6 + $0x24] ss:$16 sps:$4 sm:$0xff] (!%p211_p7)   ;;  %v691_v36 = vld [vmem:[%s873_s6 + $0x2c] ss:$16 sps:$4 sm:$0xff] (!%p211_p7)  }
  0x2a   : > { %517 = vperm.xlu0 (!%p211_p7), %682, %v647_v30   ;;  %422 = vmatpush1.bf16.msra.mxu0 (!%p211_p7), %v687_v33  ;;  %v693_v37 = vld [vmem:[%s873_s6 + $0x20] ss:$16 sps:$4 sm:$0xff] (!%p211_p7)   ;;  %v694_v38 = vld [vmem:[%s873_s6 + $0x28] ss:$16 sps:$4 sm:$0xff] (!%p211_p7)   ;;  %v695_v39 = vld [vmem:[%s873_s6 + $0x44] ss:$16 sps:$4 sm:$0xff] (!%p211_p7)  }
  0x2b   : > { %463 = vmatpush1.bf16.msra.mxu1 %v688_v34  ;;  %423 = vmatprep.subr.bf16.mxu0 %v689_v35  ;;  %v697_v40 = vld [vmem:[%s873_s6 + $0x4c] ss:$16 sps:$4 sm:$0xff]   ;;  %v699_v41 = vld [vmem:[%s873_s6 + $0x40] ss:$16 sps:$4 sm:$0xff]   ;;  %v700_v42 = vld [vmem:[%s873_s6 + $0x48] ss:$16 sps:$4 sm:$0xff]  }
  0x2c   : > { %464 = vmatprep.subr.bf16.mxu1 %v691_v36  ;;  %v701_v43 = vld [vmem:[%s873_s6 + $0x64] ss:$16 sps:$4 sm:$0xff]   ;;  %v703_v44 = vld [vmem:[%s873_s6 + $0x6c] ss:$16 sps:$4 sm:$0xff]   ;;  %v705_v45 = vld [vmem:[%s873_s6 + $0x60] ss:$16 sps:$4 sm:$0xff]  }
  0x2d   : > { %v706_v46 = vld [vmem:[%s873_s6 + $0x68] ss:$16 sps:$4 sm:$0xff]   ;;  %v707_v47 = vld [vmem:[%s873_s6 + $0x84] ss:$16 sps:$4 sm:$0xff]   ;;  %v709_v48 = vld [vmem:[%s873_s6 + $0x8c] ss:$16 sps:$4 sm:$0xff]  }
  0x2e   : > { %424 = vmatpush1.bf16.msra.mxu0 %v693_v37  ;;  %v711_v49 = vld [vmem:[%s873_s6 + $0x80] ss:$16 sps:$4 sm:$0xff]   ;;  %v712_v50 = vld [vmem:[%s873_s6 + $0x88] ss:$16 sps:$4 sm:$0xff]   ;;  %v713_v51 = vld [vmem:[%s873_s6 + $0xa4] ss:$16 sps:$4 sm:$0xff]  }
  0x2f   : > { %465 = vmatpush1.bf16.msra.mxu1 %v694_v38  ;;  %425 = vmatprep.subr.bf16.mxu0 %v695_v39  ;;  %v715_v52 = vld [vmem:[%s873_s6 + $0xac] ss:$16 sps:$4 sm:$0xff]   ;;  %v717_v53 = vld [vmem:[%s873_s6 + $0xa0] ss:$16 sps:$4 sm:$0xff]   ;;  %v718_v54 = vld [vmem:[%s873_s6 + $0xa8] ss:$16 sps:$4 sm:$0xff]  }
  0x30   : > { %466 = vmatprep.subr.bf16.mxu1 %v697_v40  ;;  %v719_v55 = vld [vmem:[%s873_s6 + $0xc4] ss:$16 sps:$4 sm:$0xff]   ;;  %v721_v56 = vld [vmem:[%s873_s6 + $0xcc] ss:$16 sps:$4 sm:$0xff]   ;;  %v723_v57 = vld [vmem:[%s873_s6 + $0xc0] ss:$16 sps:$4 sm:$0xff]  }
  0x31   : > { %v724_v58 = vld [vmem:[%s873_s6 + $0xc8] ss:$16 sps:$4 sm:$0xff]   ;;  %s929_s9 = smov (!%p242_p8, %s615_s9), 7 }
  0x32   : > { %426 = vmatpush1.bf16.msra.mxu0 %v699_v41  ;;  %s616_s10 = sshll.u32 %s929_s9, 2 }
  0x33   : > { %467 = vmatpush1.bf16.msra.mxu1 %v700_v42  ;;  %427 = vmatprep.subr.bf16.mxu0 %v701_v43  ;;  %s245_s14 = scalar_lea.vmem %s924_s3, %s616_s10 }
  0x34   : > { %468 = vmatprep.subr.bf16.mxu1 %v703_v44 }
  0x36   : > { %428 = vmatpush1.bf16.msra.mxu0 %v705_v45 }
  0x37   : > { %469 = vmatpush1.bf16.msra.mxu1 %v706_v46  ;;  %429 = vmatprep.subr.bf16.mxu0 %v707_v47 }
  0x38   : > { %470 = vmatprep.subr.bf16.mxu1 %v709_v48 }
  0x3a   : > { %430 = vmatpush1.bf16.msra.mxu0 %v711_v49 }
  0x3b   : > { %471 = vmatpush1.bf16.msra.mxu1 %v712_v50  ;;  %431 = vmatprep.subr.bf16.mxu0 %v713_v51 }
  0x3c   : > { %472 = vmatprep.subr.bf16.mxu1 %v715_v52 }
  0x3e   : > { %432 = vmatpush1.bf16.msra.mxu0 %v717_v53 }
  0x3f   : > { %473 = vmatpush1.bf16.msra.mxu1 %v718_v54  ;;  %433 = vmatprep.subr.bf16.mxu0 %v719_v55 }
  0x40   : > { %474 = vmatprep.subr.bf16.mxu1 %v721_v56 }
  0x42   : > { %434 = vmatpush1.bf16.msra.mxu0 %v723_v57 }
  0x43   : > { %475 = vmatpush1.bf16.msra.mxu1 %v724_v58 }
  0x45   : > { %645 = vmatmul.mubr.msk.bf16.vlgmr.msra.gmra.mrb[0].mxu0 %vm417_vm0, %v248_v59 }
  0x46   : > { %646 = vmatmul.mubr.msk.bf16.vlgmr.msra.gmra.mrb[0].mxu1 %vm417_vm0, %v248_v59 }
  0xa5   : > { %v507_v60 = vpop.permute.xlu0 %506 }
  0xa9   : > { %v518_v61 = vpop.permute.xlu0 %517 }
 0x118   : > { %v455_v62 = vpop.f32.mrb[0].mxu0 }
 0x119   : > { %v496_v63 = vpop.f32.mrb[0].mxu1  ;;  %v509_v0 = vmul.f32 %v507_v60, %v455_v62  ;;  %v457_v2 = vpop.f32.mrb[1].mxu0 }
 0x11a   : > { %v511_v1 = vmul.f32 %v507_v60, %v496_v63  ;;  %v498_v3 = vpop.f32.mrb[1].mxu1  ;;  %v510_v4 = vmul.f32 %v507_v60, %v457_v2  ;;  %v459_v6 = vpop.f32.mrb[2].mxu0 }
 0x11b   : > { %v512_v5 = vmul.f32 %v507_v60, %v498_v3  ;;  %v500_v7 = vpop.f32.mrb[2].mxu1  ;;  %v520_v8 = vadd.f32 %v518_v61, %v509_v0  ;;  %v460_v10 = vpop.f32.mrb[3].mxu0 }
 0x11c   : > { %v522_v9 = vadd.f32 %v518_v61, %v511_v1  ;;  %v501_v11 = vpop.f32.mrb[3].mxu1  ;;  %v521_v12 = vadd.f32 %v518_v61, %v510_v4 }
 0x11d   : > { %v523_v13 = vadd.f32 %v518_v61, %v512_v5  ;;  %v524_v14 = vmax.f32 %v520_v8, 0.0 }
 0x11e   : > { %v526_v15 = vmax.f32 %v522_v9, 0.0  ;;  %v525_v16 = vmax.f32 %v521_v12, 0.0 }
 0x11f   : > { %v527_v17 = vmax.f32 %v523_v13, 0.0 }
 0x120   : > { %v653_v18 = vpack.c.bf16 %v525_v16, %v524_v14 }
 0x121   : > { %v654_v19 = vpack.c.bf16 %v527_v17, %v526_v15 }
 0x122   : > { %544 = vst [vmem:[%s245_s14] sm:$0xff] %v653_v18 }
 0x123   : > { %545 = vst [vmem:[%s245_s14 + $0x8] sm:$0xff] %v654_v19 }
 0x124 PF: > { %p10_p9 = scmp.ge.s32.totalorder %s787_s16, 4   ;;  %s925_s12 = smov %s743_s13 }
 0x125   : > { %s926_s13 = smov %s796_s19  ;;  %s927_s14 = smov %s787_s16 }
 0x126   :  { %12 = sbr.rel (!%p10_p9) target bundleno = 2 (0x2), region = 91 }

// kernel: residual_block_forward.3
= control target key start
LH: loop header
LB: loop body
LE: loop exit
PB: predicated region body
PF: predicated region fallthrough
CT: control target
= control target key end

     0   :  { %v328_v0 = vmov 0   ;;  %v329_v2 = vmov 0.0   ;;  %vm330_vm0 = vmmov 0   ;;  %vm211_vm1 = vcmask 130048   ;;  %s448_s0 = inlined_call_operand.vmem [shape: bf16[224,128], index: 0, kind: input, shape index: {}]   ;;  %s449_s3 = inlined_call_operand.vmem [shape: bf16[16,128], index: 3, kind: input, shape index: {}]   ;;  %s450_s4 = inlined_call_operand.vmem [shape: bf16[8,16], index: 4, kind: input, shape index: {}]   ;;  %s451_s1 = inlined_call_operand.vmem [shape: bf16[8,224], index: 1, kind: input, shape index: {}]   ;;  %s452_s2 = inlined_call_operand.vmem [shape: f32[2,8,1], index: 2, kind: input, shape index: {}]   ;;  %s453_s5 = inlined_call_operand.vmem [shape: f32[2,8,1], index: 5, kind: input, shape index: {}]   ;;  %s454_s6 = inlined_call_operand.vmem [shape: f32[8,128], index: 6, kind: output, shape index: {}]  }
   0x1   :  { %147 = vmatprep.subr.bf16.mxu0 %v328_v0  ;;  %v311_v1 = vld [vmem:[%s448_s0] sm:$0xff]   ;;  %300 = vmatprep.subr.bf16.mxu1 %v329_v2  ;;  %v312_v3 = vld [vmem:[%s448_s0 + $0x8] sm:$0xff]   ;;  %v313_v4 = vld [vmem:[%s448_s0 + $0x10] sm:$0xff]   ;;  %vm143_vm2 = vcmask 785408  }
   0x2   :  { %302 = vmatprep.mubr.msk.bf16.mxu1 %vm330_vm0, %v329_v2  ;;  %309 = vset.pattern.permute.xlu0 %v328_v0  ;;  %v314_v5 = vld [vmem:[%s448_s0 + $0x18] sm:$0xff]   ;;  %v324_v6 = vld [vmem:[%s449_s3] sm:$0xff]   ;;  %v294_v12 = vld [vmem:[%s452_s2 + $0x8] sm:$0xff] }
   0x3   :  { %148 = vmatpush1.bf16.msra.mxu0 %v311_v1  ;;  %310 = vset.pattern.permute.xlu1 %v328_v0  ;;  %v315_v7 = vld [vmem:[%s448_s0 + $0x20] sm:$0xff]   ;;  %v316_v14 = vld [vmem:[%s448_s0 + $0x28] sm:$0xff]   ;;  %v317_v16 = vld [vmem:[%s448_s0 + $0x30] sm:$0xff]  }
   0x4   :  { %149 = vmatprep.subr.bf16.mxu0 %v328_v0  ;;  %301 = vmatpush3.bf16.msra.mxu1 %v324_v6  ;;  %v202_v8 = vld [vmem:[%s450_s4] sm:$0xf]  ;;  %v297_v15 = vld [vmem:[%s453_s5 + $0x8] sm:$0xff]  ;;  %v318_v17 = vld [vmem:[%s448_s0 + $0x38] sm:$0xff]  }
   0x5   :  { %v24_v9 = vld [vmem:[%s451_s1] sm:$0xff]  ;;  %198 = vperm.xlu1 %310, %v294_v12   ;;  %v320_v19 = vld [vmem:[%s448_s0 + $0x48] sm:$0xff]   ;;  %v321_v20 = vld [vmem:[%s448_s0 + $0x50] sm:$0xff]  }
   0x6   :  { %v187_v10 = vld [vmem:[%s452_s2] sm:$0xff]  ;;  %v278_v11 = vcombine.high %v24_v9, %v24_v9  ;;  %v322_v21 = vld [vmem:[%s448_s0 + $0x58] sm:$0xff]   ;;  %v325_v23 = vld [vmem:[%s448_s0 + $0x68] sm:$0xff]   ;;  %v277_v24 = vcombine.low %v24_v9, %v24_v9 }
   0x7   :  { %150 = vmatpush1.bf16.msra.mxu0 %v312_v3  ;;  %190 = vperm.xlu0 %309, %v187_v10   ;;  %v255_v13 = vld [vmem:[%s453_s5] sm:$0xff] }
   0x8   :  { %151 = vmatprep.subr.bf16.mxu0 %v328_v0  ;;  %303 = vmatmul.mubr.msk.bf16.vlgmr.msra.gmra.mrb[0].mxu1 %vm211_vm1, %v202_v8  ;;  %v319_v18 = vld [vmem:[%s448_s0 + $0x40] sm:$0xff]  }
   0x9   :  { %293 = vmatprep.mubr.msk.bf16.mxu0 %vm143_vm2, %v278_v11  ;;  %266 = vperm.xlu1 %310, %v297_v15   ;;  %v323_v22 = vld [vmem:[%s448_s0 + $0x60] sm:$0xff]  }
   0xb   :  { %152 = vmatpush1.bf16.msra.mxu0 %v313_v4  ;;  %258 = vperm.xlu0 %309, %v255_v13  }
   0xc   :  { %153 = vmatprep.subr.bf16.mxu0 %v328_v0 }
   0xf   :  { %154 = vmatpush1.bf16.msra.mxu0 %v314_v5 }
  0x10   :  { %155 = vmatprep.subr.bf16.mxu0 %v328_v0 }
  0x13   :  { %156 = vmatpush1.bf16.msra.mxu0 %v315_v7 }
  0x14   :  { %157 = vmatprep.subr.bf16.mxu0 %v328_v0 }
  0x17   :  { %158 = vmatpush1.bf16.msra.mxu0 %v316_v14 }
  0x18   :  { %159 = vmatprep.subr.bf16.mxu0 %v328_v0 }
  0x1b   :  { %160 = vmatpush1.bf16.msra.mxu0 %v317_v16 }
  0x1c   :  { %161 = vmatprep.subr.bf16.mxu0 %v328_v0 }
  0x1f   :  { %162 = vmatpush1.bf16.msra.mxu0 %v318_v17 }
  0x20   :  { %163 = vmatprep.subr.bf16.mxu0 %v328_v0 }
  0x23   :  { %164 = vmatpush1.bf16.msra.mxu0 %v319_v18 }
  0x24   :  { %165 = vmatprep.subr.bf16.mxu0 %v328_v0 }
  0x27   :  { %166 = vmatpush1.bf16.msra.mxu0 %v320_v19 }
  0x28   :  { %167 = vmatprep.subr.bf16.mxu0 %v328_v0 }
  0x2b   :  { %168 = vmatpush1.bf16.msra.mxu0 %v321_v20 }
  0x2c   :  { %169 = vmatprep.subr.bf16.mxu0 %v328_v0 }
  0x2f   :  { %170 = vmatpush1.bf16.msra.mxu0 %v322_v21 }
  0x30   :  { %171 = vmatprep.subr.bf16.mxu0 %v328_v0 }
  0x33   :  { %172 = vmatpush1.bf16.msra.mxu0 %v323_v22 }
  0x34   :  { %173 = vmatprep.subr.bf16.mxu0 %v328_v0 }
  0x37   :  { %174 = vmatpush1.bf16.msra.mxu0 %v325_v23 }
  0x3a   :  { %180 = vmatmul.mubr.bf16.vlgmr.msra.gmra.mrb[0].mxu0 %v277_v24 }
  0x84   :  { %v199_v30 = vpop.permute.xlu1 %198 }
  0x86   :  { %v191_v29 = vpop.permute.xlu0 %190 }
  0x88   :  { %v267_v33 = vpop.permute.xlu1 %266 }
  0x8a   :  { %v259_v31 = vpop.permute.xlu0 %258 }
  0xdb   :  { %v249_v25 = vpop.f32.mrb[0].mxu1 }
  0xdc   :  { %v304_v26 = vpop.f32.mrb[1].mxu1  ;;  %v261_v32 = vmul.f32 %v259_v31, %v249_v25 }
  0xdd   :  { %v252_v27 = vpop.f32.mrb[2].mxu1 }
  0xde   :  { %v305_v28 = vpop.f32.mrb[3].mxu1  ;;  %v269_v38 = vadd.f32 %v267_v33, %v261_v32 }
 0x10d   :  { %v181_v34 = vpop.f32.mrb[0].mxu0 }
 0x10e   :  { %v193_v35 = vmul.f32 %v191_v29, %v181_v34  ;;  %v183_v36 = vpop.f32.mrb[1].mxu0 }
 0x10f   :  { %v184_v37 = vpop.f32.mrb[2].mxu0 }
 0x110   :  { %v201_v39 = vadd.f32 %v199_v30, %v193_v35  ;;  %v185_v40 = vpop.f32.mrb[3].mxu0 }
 0x112   :  { %v270_v41 = vadd.f32 %v269_v38, %v201_v39 }
 0x114   :  { %v271_v42 = vmax.f32 %v270_v41, 0.0 }
 0x116   :  { %272 = vst [vmem:[%s454_s6] sm:$0xff] %v271_v42 }

</bundles_post_ra>
